<compile_context>
chip_gen: v7x
topology: tpu7x:2x2x1
jax: 0.10.0
libtpu: 0.0.40
codegen_flags: <defaults>
</compile_context>

<pallas_src>
import functools

import jax
import jax.numpy as jnp
from jax.experimental import pallas as pl
from jax.experimental.pallas import tpu as pltpu


def _round_up(x, m):
    return ((x + m - 1) // m) * m


@functools.lru_cache(maxsize=None)
def _max_mxu_tile():
    # v6e / v7x have 256-wide MXUs; v5e and older are 128-wide.
    try:
        kind = jax.devices()[0].device_kind.lower()
    except Exception:
        return 128
    if any(tag in kind for tag in ("v2", "v3", "v4", "v5")):
        return 128
    return 256


def _pick_tile(dim, align, pref):
    """Tile for `dim`: multiple of `align`; small dims are padded up whole."""
    if dim <= pref:
        return _round_up(dim, align)
    cands = sorted({t for t in (pref, 256, 128) if t <= pref and t % align == 0})
    # Least padding first, then larger tile.
    return min(cands, key=lambda t: (_round_up(dim, t) - dim, -t))


def _row_tile(rows, row_words):
    """Row-tile for elementwise kernels, ~1 MiB per streamed buffer."""
    budget = 1 << 20
    tr = min(512, max(8, (budget // (row_words * 4)) // 8 * 8))
    return min(tr, _round_up(rows, 8))


# ---------------------------------------------------------------------------
# Tiled matmul kernel (bf16 MXU inputs, f32 accumulation into the output).
# ---------------------------------------------------------------------------
def _matmul_kernel(a_ref, b_ref, o_ref):
    @pl.when(pl.program_id(2) == 0)
    def _():
        o_ref[...] = jnp.zeros_like(o_ref)

    o_ref[...] += jnp.dot(a_ref[...], b_ref[...],
                          preferred_element_type=jnp.float32)


@functools.lru_cache(maxsize=None)
def _matmul_call(Mp, Kp, Np, tm, tn, tk):
    f = pl.pallas_call(
        _matmul_kernel,
        out_shape=jax.ShapeDtypeStruct((Mp, Np), jnp.float32),
        grid_spec=pltpu.PrefetchScalarGridSpec(
            num_scalar_prefetch=0,
            grid=(Mp // tm, Np // tn, Kp // tk),
            in_specs=[
                pl.BlockSpec((tm, tk), lambda i, j, k: (i, k)),
                pl.BlockSpec((tk, tn), lambda i, j, k: (k, j)),
            ],
            out_specs=pl.BlockSpec((tm, tn), lambda i, j, k: (i, j)),
        ),
        compiler_params=pltpu.CompilerParams(
            dimension_semantics=("parallel", "parallel", "arbitrary")),
        cost_estimate=pl.CostEstimate(
            flops=2 * Mp * Np * Kp, transcendentals=0,
            bytes_accessed=(Mp * Kp + Kp * Np) * 2 + Mp * Np * 4),
    )
    return jax.jit(f)


def pallas_matmul(a, b):
    """a: (M, K), b: (K, N) -> (M, N) f32.  MXU fed in bf16, f32 accumulate."""
    M, K = a.shape
    K2, N = b.shape
    assert K == K2
    a = a.astype(jnp.bfloat16)
    b = b.astype(jnp.bfloat16)
    maxt = _max_mxu_tile()
    tm = _pick_tile(M, 8, maxt)
    tn = _pick_tile(N, 128, maxt)
    tk = _pick_tile(K, 128, 512)
    Mp, Kp, Np = _round_up(M, tm), _round_up(K, tk), _round_up(N, tn)
    if (Mp, Kp) != (M, K):
        a = jnp.pad(a, ((0, Mp - M), (0, Kp - K)))
    if (Kp, Np) != (K, N):
        b = jnp.pad(b, ((0, Kp - K), (0, Np - N)))
    out = _matmul_call(Mp, Kp, Np, tm, tn, tk)(a, b)
    if (Mp, Np) != (M, N):
        out = out[:M, :N]
    return out


# ---------------------------------------------------------------------------
# Grouped matmul: one kernel with a leading (squeezed) group grid axis.
# ---------------------------------------------------------------------------
def _gmm_kernel(a_ref, b_ref, o_ref):
    @pl.when(pl.program_id(3) == 0)
    def _():
        o_ref[...] = jnp.zeros_like(o_ref)

    o_ref[...] += jnp.dot(a_ref[...], b_ref[...],
                          preferred_element_type=jnp.float32)


@functools.lru_cache(maxsize=None)
def _gmm_call(G, Mp, Kp, Np, tm, tn, tk):
    f = pl.pallas_call(
        _gmm_kernel,
        out_shape=jax.ShapeDtypeStruct((G, Mp, Np), jnp.float32),
        grid_spec=pltpu.PrefetchScalarGridSpec(
            num_scalar_prefetch=0,
            grid=(G, Mp // tm, Np // tn, Kp // tk),
            in_specs=[
                pl.BlockSpec((None, tm, tk), lambda g, i, j, k: (g, i, k)),
                pl.BlockSpec((None, tk, tn), lambda g, i, j, k: (g, k, j)),
            ],
            out_specs=pl.BlockSpec((None, tm, tn), lambda g, i, j, k: (g, i, j)),
        ),
        compiler_params=pltpu.CompilerParams(
            dimension_semantics=("parallel", "parallel", "parallel",
                                 "arbitrary")),
        cost_estimate=pl.CostEstimate(
            flops=2 * G * Mp * Np * Kp, transcendentals=0,
            bytes_accessed=G * ((Mp * Kp + Kp * Np) * 2 + Mp * Np * 4)),
    )
    return jax.jit(f)


def pallas_grouped_matmul(a, b):
    """a: (G, M, K), b: (G, K, N) -> (G, M, N) f32."""
    G, M, K = a.shape
    _, K2, N = b.shape
    assert K == K2
    a = a.astype(jnp.bfloat16)
    b = b.astype(jnp.bfloat16)
    maxt = _max_mxu_tile()
    tm = _pick_tile(M, 8, maxt)
    tn = _pick_tile(N, 128, maxt)
    tk = _pick_tile(K, 128, 512)
    Mp, Kp, Np = _round_up(M, tm), _round_up(K, tk), _round_up(N, tn)
    if (Mp, Kp) != (M, K):
        a = jnp.pad(a, ((0, 0), (0, Mp - M), (0, Kp - K)))
    if (Kp, Np) != (K, N):
        b = jnp.pad(b, ((0, 0), (0, Kp - K), (0, Np - N)))
    out = _gmm_call(G, Mp, Kp, Np, tm, tn, tk)(a, b)
    if (Mp, Np) != (M, N):
        out = out[:, :M, :N]
    return out


# ---------------------------------------------------------------------------
# BatchNorm (batch statistics, gamma=1, beta=0), fused with ReLU / residual.
# Stage 1: grid-accumulated per-channel sum / sum-of-squares.
# Stage 2: tiled normalize (+ optional residual, optional 2nd BN, ReLU).
# ---------------------------------------------------------------------------
def _bn_stats_kernel(x_ref, s_ref, q_ref):
    @pl.when(pl.program_id(0) == 0)
    def _():
        s_ref[...] = jnp.zeros_like(s_ref)
        q_ref[...] = jnp.zeros_like(q_ref)

    x = x_ref[...]
    s_ref[...] += jnp.sum(x, axis=0, keepdims=True)
    q_ref[...] += jnp.sum(x * x, axis=0, keepdims=True)


@functools.lru_cache(maxsize=None)
def _bn_stats_call(Rp, Cp, tr):
    f = pl.pallas_call(
        _bn_stats_kernel,
        out_shape=(jax.ShapeDtypeStruct((1, Cp), jnp.float32),
                   jax.ShapeDtypeStruct((1, Cp), jnp.float32)),
        grid_spec=pltpu.PrefetchScalarGridSpec(
            num_scalar_prefetch=0,
            grid=(Rp // tr,),
            in_specs=[pl.BlockSpec((tr, Cp), lambda i: (i, 0))],
            out_specs=(pl.BlockSpec((1, Cp), lambda i: (0, 0)),
                       pl.BlockSpec((1, Cp), lambda i: (0, 0))),
        ),
        compiler_params=pltpu.CompilerParams(
            dimension_semantics=("arbitrary",)),
    )
    return jax.jit(f)


def _make_bn_apply_kernel(n_rows, relu, mode):
    inv_n = 1.0 / float(n_rows)

    def norm(x, s, q):
        mean = s * inv_n
        var = jnp.maximum(q * inv_n - mean * mean, 0.0)
        return (x - mean) * jax.lax.rsqrt(var + 1e-5)

    def finish(y, o_ref):
        o_ref[...] = jnp.maximum(y, 0.0) if relu else y

    if mode == "plain":
        def kernel(x_ref, s_ref, q_ref, o_ref):
            finish(norm(x_ref[...], s_ref[...], q_ref[...]), o_ref)
    elif mode == "res_raw":
        def kernel(x_ref, r_ref, s_ref, q_ref, o_ref):
            finish(norm(x_ref[...], s_ref[...], q_ref[...]) + r_ref[...], o_ref)
    else:  # "res_bn": normalize both operands, add, relu
        def kernel(x_ref, r_ref, s_ref, q_ref, s2_ref, q2_ref, o_ref):
            y = (norm(x_ref[...], s_ref[...], q_ref[...]) +
                 norm(r_ref[...], s2_ref[...], q2_ref[...]))
            finish(y, o_ref)
    return kernel


@functools.lru_cache(maxsize=None)
def _bn_apply_call(Rp, Cp, tr, n_rows, relu, mode):
    kernel = _make_bn_apply_kernel(n_rows, relu, mode)
    big = pl.BlockSpec((tr, Cp), lambda i: (i, 0))
    small = pl.BlockSpec((1, Cp), lambda i: (0, 0))
    if mode == "plain":
        in_specs = [big, small, small]
    elif mode == "res_raw":
        in_specs = [big, big, small, small]
    else:
        in_specs = [big, big, small, small, small, small]
    f = pl.pallas_call(
        kernel,
        out_shape=jax.ShapeDtypeStruct((Rp, Cp), jnp.float32),
        grid_spec=pltpu.PrefetchScalarGridSpec(
            num_scalar_prefetch=0,
            grid=(Rp // tr,),
            in_specs=in_specs,
            out_specs=big,
        ),
        compiler_params=pltpu.CompilerParams(
            dimension_semantics=("parallel",)),
    )
    return jax.jit(f)


def _pad2d(x2d, Rp, Cp):
    R, C = x2d.shape
    if (Rp, Cp) != (R, C):
        x2d = jnp.pad(x2d, ((0, Rp - R), (0, Cp - C)))
    return x2d


def bn_relu(x, relu=True):
    """Training-mode BatchNorm (gamma=1, beta=0) + optional ReLU on NHWC."""
    N, H, W, C = x.shape
    R = N * H * W
    Cp = _round_up(C, 128)
    tr = _row_tile(R, Cp)
    Rp = _round_up(R, tr)
    xf = _pad2d(x.reshape(R, C), Rp, Cp)
    s, q = _bn_stats_call(Rp, Cp, tr)(xf)
    y = _bn_apply_call(Rp, Cp, tr, R, relu, "plain")(xf, s, q)
    return y[:R, :C].reshape(N, H, W, C)


def bn_add_relu(x, res, res_has_bn):
    """relu( BN(x) + (BN(res) if res_has_bn else res) ) on NHWC."""
    N, H, W, C = x.shape
    R = N * H * W
    Cp = _round_up(C, 128)
    tr = _row_tile(R, Cp)
    Rp = _round_up(R, tr)
    xf = _pad2d(x.reshape(R, C), Rp, Cp)
    rf = _pad2d(res.reshape(R, C), Rp, Cp)
    s, q = _bn_stats_call(Rp, Cp, tr)(xf)
    if res_has_bn:
        s2, q2 = _bn_stats_call(Rp, Cp, tr)(rf)
        y = _bn_apply_call(Rp, Cp, tr, R, True, "res_bn")(xf, rf, s, q, s2, q2)
    else:
        y = _bn_apply_call(Rp, Cp, tr, R, True, "res_raw")(xf, rf, s, q)
    return y[:R, :C].reshape(N, H, W, C)


# ---------------------------------------------------------------------------
# MaxPool 3x3 / stride 2 / pad 1 : tiled max-reduce over the 9 window taps.
# ---------------------------------------------------------------------------
def _maxpool_kernel(x_ref, o_ref):
    o_ref[...] = jnp.max(x_ref[...], axis=0)


@functools.lru_cache(maxsize=None)
def _maxpool_call(Mp, Cp, tr):
    f = pl.pallas_call(
        _maxpool_kernel,
        out_shape=jax.ShapeDtypeStruct((Mp, Cp), jnp.float32),
        grid_spec=pltpu.PrefetchScalarGridSpec(
            num_scalar_prefetch=0,
            grid=(Mp // tr,),
            in_specs=[pl.BlockSpec((9, tr, Cp), lambda i: (0, i, 0))],
            out_specs=pl.BlockSpec((tr, Cp), lambda i: (i, 0)),
        ),
        compiler_params=pltpu.CompilerParams(
            dimension_semantics=("parallel",)),
    )
    return jax.jit(f)


def maxpool3x3s2p1(x):
    N, H, W, C = x.shape
    stride, pad, k = 2, 1, 3
    Ho = (H + 2 * pad - k) // stride + 1
    Wo = (W + 2 * pad - k) // stride + 1
    xp = jnp.pad(x, ((0, 0), (pad, pad), (pad, pad), (0, 0)),
                 constant_values=-jnp.inf)
    taps = [xp[:, dy:dy + stride * Ho:stride, dx:dx + stride * Wo:stride, :]
            for dy in range(k) for dx in range(k)]
    patches = jnp.stack(taps, axis=0).reshape(9, N * Ho * Wo, C)
    M = N * Ho * Wo
    Cp = _round_up(C, 128)
    tr = _row_tile(M, Cp * 9)
    Mp = _round_up(M, tr)
    if (Mp, Cp) != (M, C):
        patches = jnp.pad(patches, ((0, 0), (0, Mp - M), (0, Cp - C)),
                          constant_values=-jnp.inf)
    y = _maxpool_call(Mp, Cp, tr)(patches)
    return y[:M, :C].reshape(N, Ho, Wo, C)


# ---------------------------------------------------------------------------
# Global average pool (AdaptiveAvgPool2d((1,1))).  Tiny at this point (HW<=64).
# ---------------------------------------------------------------------------
def _avgpool_kernel(x_ref, o_ref):
    o_ref[...] = jnp.mean(x_ref[...], axis=1)


@functools.lru_cache(maxsize=None)
def _avgpool_call(N, HW, Cp):
    f = pl.pallas_call(
        _avgpool_kernel,
        out_shape=jax.ShapeDtypeStruct((N, Cp), jnp.float32),
        grid=(1,),
        in_specs=[pl.BlockSpec((N, HW, Cp), lambda i: (0, 0, 0))],
        out_specs=pl.BlockSpec((N, Cp), lambda i: (0, 0)),
    )
    return jax.jit(f)


def global_avgpool(x):
    N, H, W, C = x.shape
    Cp = _round_up(C, 128)
    xf = x.reshape(N, H * W, C)
    if Cp != C:
        xf = jnp.pad(xf, ((0, 0), (0, 0), (0, Cp - C)))
    y = _avgpool_call(N, H * W, Cp)(xf)
    return y[:, :C]


# ---------------------------------------------------------------------------
# Convolutions: im2col (XLA glue, bf16) + Pallas MXU matmul.
# ---------------------------------------------------------------------------
def _im2col(x, kh, kw, stride, pad):
    N, H, W, C = x.shape
    Ho = (H + 2 * pad - kh) // stride + 1
    Wo = (W + 2 * pad - kw) // stride + 1
    xp = jnp.pad(x, ((0, 0), (pad, pad), (pad, pad), (0, 0)))
    taps = [xp[:, dy:dy + stride * Ho:stride, dx:dx + stride * Wo:stride, :]
            for dy in range(kh) for dx in range(kw)]
    patches = jnp.stack(taps, axis=3)          # (N, Ho, Wo, kh*kw, C)
    return patches, Ho, Wo


def conv2d(x, w, stride=1, pad=0, groups=1):
    """x: NHWC f32; w: PyTorch layout (Cout, Cin//groups, kh, kw) -> NHWC f32."""
    N, H, W, C = x.shape
    Cout, cg, kh, kw = w.shape
    xb = x.astype(jnp.bfloat16)
    wb = w.astype(jnp.bfloat16)

    if kh == 1 and kw == 1 and groups == 1 and pad == 0:
        xs = xb[:, ::stride, ::stride, :] if stride > 1 else xb
        _, Ho, Wo, _ = xs.shape
        a = xs.reshape(N * Ho * Wo, C)
        b = wb.reshape(Cout, C).T
        return pallas_matmul(a, b).reshape(N, Ho, Wo, Cout)

    # TODO(synk): stream im2col taps through the matmul K grid axis via
    # BlockSpec index_map offsets instead of materializing patches in HBM.
    patches, Ho, Wo = _im2col(xb, kh, kw, stride, pad)
    M = N * Ho * Wo
    if groups == 1:
        a = patches.reshape(M, kh * kw * C)
        b = jnp.transpose(wb, (2, 3, 1, 0)).reshape(kh * kw * C, Cout)
        return pallas_matmul(a, b).reshape(N, Ho, Wo, Cout)

    og = Cout // groups
    a = patches.reshape(M, kh * kw, groups, cg)
    a = jnp.transpose(a, (2, 0, 1, 3)).reshape(groups, M, kh * kw * cg)
    b = wb.reshape(groups, og, cg, kh, kw)
    b = jnp.transpose(b, (0, 3, 4, 2, 1)).reshape(groups, kh * kw * cg, og)
    y = pallas_grouped_matmul(a, b)                       # (groups, M, og)
    return jnp.transpose(y, (1, 0, 2)).reshape(N, Ho, Wo, Cout)


# ---------------------------------------------------------------------------
# ResNext model definition (matches the PyTorch module structure).
# ---------------------------------------------------------------------------
# (inplanes, planes, stride, down) for the 16 bottleneck blocks.
BLOCK_SPECS = [
    (64, 64, 1, True), (256, 64, 1, False), (256, 64, 1, False),
    (256, 128, 2, True), (512, 128, 1, False), (512, 128, 1, False),
    (512, 128, 1, False),
    (512, 156, 2, True), (624, 156, 1, False), (624, 156, 1, False),
    (624, 156, 1, False), (624, 156, 1, False), (624, 156, 1, False),
    (624, 512, 2, True), (2048, 512, 1, False), (2048, 512, 1, False),
]


def _init_conv(key, cout, cin_g, kh, kw):
    # kaiming_normal_(mode='fan_out', nonlinearity='relu')
    std = (2.0 / (cout * kh * kw)) ** 0.5
    return jax.random.normal(key, (cout, cin_g, kh, kw), jnp.float32) * std


def init_params(key, groups, base_width):
    keys = iter(jax.random.split(key, 128))
    params = {"conv1": _init_conv(next(keys), 64, 3, 7, 7), "blocks": []}
    for (inplanes, planes, _stride, down) in BLOCK_SPECS:
        width = int(planes * (base_width / 64.0)) * groups
        expanded = planes * 4
        p = {
            "conv1": _init_conv(next(keys), width, inplanes, 1, 1),
            "conv2": _init_conv(next(keys), width, width // groups, 3, 3),
            "conv3": _init_conv(next(keys), expanded, width, 1, 1),
        }
        if down:
            p["down"] = _init_conv(next(keys), expanded, inplanes, 1, 1)
        params["blocks"].append(p)
    bound = 1.0 / (2048 ** 0.5)
    params["fc_w"] = jax.random.uniform(next(keys), (17, 2048), jnp.float32,
                                        -bound, bound)
    params["fc_b"] = jax.random.uniform(next(keys), (17,), jnp.float32,
                                        -bound, bound)
    return params


def bottleneck_forward(x, p, stride, down, groups):
    out = conv2d(x, p["conv1"], stride=1, pad=0)
    out = bn_relu(out)
    out = conv2d(out, p["conv2"], stride=stride, pad=1, groups=groups)
    out = bn_relu(out)
    out = conv2d(out, p["conv3"], stride=1, pad=0)
    if down:
        identity = conv2d(x, p["down"], stride=stride, pad=0)
        return bn_add_relu(out, identity, res_has_bn=True)
    return bn_add_relu(out, x, res_has_bn=False)


def resnext_forward(x_nchw, params, groups):
    # Accept NCHW (PyTorch layout), compute in NHWC internally.
    x = jnp.transpose(x_nchw, (0, 2, 3, 1)).astype(jnp.float32)
    # input layer: conv7x7/2 -> BN -> ReLU -> maxpool3x3/2
    x = conv2d(x, params["conv1"], stride=2, pad=3)
    x = bn_relu(x)
    x = maxpool3x3s2p1(x)
    # 16 bottleneck blocks
    for p, (_inp, _pl, stride, down) in zip(params["blocks"], BLOCK_SPECS):
        x = bottleneck_forward(x, p, stride, down, groups)
    # adaptive avg pool -> flatten -> fc
    pooled = global_avgpool(x)                           # (N, 2048)
    logits = pallas_matmul(pooled, params["fc_w"].T) + params["fc_b"]
    return logits


if __name__ == "__main__":
    groups, width_per_group = 2, 16   # ResNeXt grouping config
    key = jax.random.PRNGKey(0)
    kp, kx = jax.random.split(key)
    params = init_params(kp, groups, width_per_group)
    # small input: batch=2, 3 channels, 32x32 spatial (divides cleanly by 32)
    x = jax.random.normal(kx, (2, 3, 32, 32), jnp.float32)
    out = resnext_forward(x, params, groups)
    out = jax.block_until_ready(out)
    assert out.shape == (2, 17)
    assert bool(jnp.all(jnp.isfinite(out)))
    print("KERNEL_OK")
</pallas_src>

<mosaic_0001>
module attributes {stable_mosaic.version = 11 : i64} {
  func.func @_matmul_kernel(%arg0: i32, %arg1: i32, %arg2: i32, %arg3: memref<256x256xbf16, #tpu.memory_space<vmem>>, %arg4: memref<256x128xbf16, #tpu.memory_space<vmem>>, %arg5: memref<256x128xf32, #tpu.memory_space<vmem>>) attributes {dimension_semantics = [#tpu.dimension_semantics<parallel>, #tpu.dimension_semantics<parallel>, #tpu.dimension_semantics<arbitrary>], iteration_bounds = array<i64: 2, 1, 1>, scalar_prefetch = 0 : i64, scratch_operands = 0 : i64, tpu.core_type = #tpu.core_type<tc>, window_params = [{transform_indices = @transform_0, window_bounds = array<i64: 256, 256>}, {transform_indices = @transform_1, window_bounds = array<i64: 256, 128>}, {transform_indices = @transform_2, window_bounds = array<i64: 256, 128>}]} {
    %c0_i32 = arith.constant 0 : i32
    %0 = arith.cmpi eq, %arg2, %c0_i32 : i32
    %1 = arith.extui %0 : i1 to i32
    %c0_i32_0 = arith.constant 0 : i32
    %2 = arith.cmpi ne, %1, %c0_i32_0 : i32
    scf.if %2 {
      %cst_8 = arith.constant 0.000000e+00 : f32
      %9 = vector.broadcast %cst_8 : f32 to vector<256x128xf32>
      %c0_9 = arith.constant 0 : index
      %c0_10 = arith.constant 0 : index
      %10 = vector.load %arg5[%c0_9, %c0_10] : memref<256x128xf32, #tpu.memory_space<vmem>>, vector<256x128xf32>
      tpu.vector_store %arg5[%c0_9, %c0_10], %9 {strides = array<i32>} : memref<256x128xf32, #tpu.memory_space<vmem>>, vector<256x128xf32>,
    } else {
    }
    %c0 = arith.constant 0 : index
    %c0_1 = arith.constant 0 : index
    %3 = vector.load %arg5[%c0, %c0_1] : memref<256x128xf32, #tpu.memory_space<vmem>>, vector<256x128xf32>
    %c0_2 = arith.constant 0 : index
    %c0_3 = arith.constant 0 : index
    %4 = vector.load %arg3[%c0_2, %c0_3] : memref<256x256xbf16, #tpu.memory_space<vmem>>, vector<256x256xbf16>
    %c0_4 = arith.constant 0 : index
    %c0_5 = arith.constant 0 : index
    %5 = vector.load %arg4[%c0_4, %c0_5] : memref<256x128xbf16, #tpu.memory_space<vmem>>, vector<256x128xbf16>
    %cst = arith.constant dense<0.000000e+00> : vector<256x128xf32>
    %6 = tpu.matmul %4, %5, %cst {dimension_numbers = #tpu.dot_dimension_numbers<[1], [0], [0], [1], [0, 0, 1, 1], [], []>} : vector<256x256xbf16>, vector<256x128xbf16>, vector<256x128xf32> -> vector<256x128xf32>
    %7 = arith.addf %3, %6 : vector<256x128xf32>
    %c0_6 = arith.constant 0 : index
    %c0_7 = arith.constant 0 : index
    %8 = vector.load %arg5[%c0_6, %c0_7] : memref<256x128xf32, #tpu.memory_space<vmem>>, vector<256x128xf32>
    tpu.vector_store %arg5[%c0_6, %c0_7], %7 {strides = array<i32>} : memref<256x128xf32, #tpu.memory_space<vmem>>, vector<256x128xf32>,
    return
  }
  func.func @transform_0(%arg0: i32, %arg1: i32, %arg2: i32) -> (i32, i32) {
    %c0_i32 = arith.constant 0 : i32
    return %arg0, %arg2 : i32, i32
  }
  func.func @transform_1(%arg0: i32, %arg1: i32, %arg2: i32) -> (i32, i32) {
    %c0_i32 = arith.constant 0 : i32
    return %arg2, %arg1 : i32, i32
  }
  func.func @transform_2(%arg0: i32, %arg1: i32, %arg2: i32) -> (i32, i32) {
    %c0_i32 = arith.constant 0 : i32
    return %arg0, %arg1 : i32, i32
  }
}

</mosaic_0001>

<bundles_post_ra>
// kernel: tpu_custom_call.1
= control target key start
LH: loop header
LB: loop body
LE: loop exit
PB: predicated region body
PF: predicated region fallthrough
CT: control target
= control target key end

     0   :  { %7 = vsyncpa [#allocation3], 0  ;;  %s1753_s0 = inlined_call_operand.hbm [shape: bf16[512,256], index: 0, kind: input, shape index: {}]   ;;  %s1754_s1 = inlined_call_operand.hbm [shape: bf16[256,128], index: 1, kind: input, shape index: {}]   ;;  %s1755_s2 = inlined_call_operand.hbm [shape: f32[512,128], index: 2, kind: output, shape index: {}]  }
   0x1   :  { %9 = vsyncpa [#allocation3 + $0x1], 0 }
   0x2   :  { %10 = vsyncpa [#allocation6], 0 }
   0x3   :  { %11 = vsyncpa [#allocation4], 0 }
   0x4   :  { %13 = vsyncpa [#allocation4 + $0x1], 0  ;;  %s1461_s9 = smov 0   ;;  %s1463_s10 = smov 0  }
   0x5   :  { %s1465_s11 = smov 0   ;;  %s1467_s12 = smov 0  }
   0x6   :  { %s1469_s13 = smov 0   ;;  %s1471_s14 = smov 0  }
   0x7 LB: > { %s950_s15 = sadd.s32 4294967295, %s1435_s14   ;;  %s951_s16 = sadd.s32 4294967294, %s1435_s14   ;;  %s1435_s14 = sphi %s1471_s14, %s19_s14   ;;  %s1431_s13 = sphi %s1469_s13, %s1779_s13   ;;  %s1427_s12 = sphi %s1467_s12, %s1778_s12   ;;  %s1423_s11 = sphi %s1465_s11, %s1777_s11   ;;  %s1419_s10 = sphi %s1463_s10, %s1776_s10   ;;  %s1415_s9 = sphi %s1461_s9, %s1775_s9  }
   0x8   : > { %p60_p0 = scmp.ne.s32.totalorder %s1419_s10, %s1415_s9  ;;  %p1495_p1 = scmp.eq.s32.totalorder %s950_s15, 0 }
   0x9   : > { %p1499_p2 = scmp.eq.s32.totalorder %s950_s15, 1  ;;  %p120_p3 = scmp.eq.s32.totalorder %s951_s16, 1 }
   0xa   : > { %s1760_s17 = scalar_select %p1495_p1, 1, 0 }
   0xb   : > { %s1761_s18 = scalar_select %p1499_p2, 1, 0 }
   0xc   : > { %p1505_p4 = por %p1495_p1, %p60_p0  ;;  %p952_p5 = scmp.ge.s32.totalorder %s1435_s14, 1 }
   0xd   : > { %p1510_p6 = por %p120_p3, %p60_p0  ;;  %p127_p7 = scmp.lt.s32.totalorder %s1435_s14, 3 }
   0xe   : > { %s1762_s19 = scalar_select %p1505_p4, 1, 0 }
   0xf   : > { %s1763_s20 = scalar_select %p1510_p6, 1, 0 }
  0x10   : > { %p1515_p8 = pnand %p952_p5, %p127_p7  ;;  %s1437_s22 = smov [#allocation5]  }
  0x11   : > { %s143_s23 = sshll.u32 %s1437_s22, 4  ;;  %s38_s25 = sadd.s32 1, %s1431_s13  ;;  %s144_s23 = int_to_ptr.vmem [resolvable:$true] %s143_s23 }
  0x12   : > { %s1764_s21 = scalar_select %p1515_p8, 1, 0 }
  0x13   : > { %p1155_p9 = pneg %p1515_p8  ;;  %s1291_s28 = scalar_lea.hbm %s1754_s1, 2048 }
  0x14   : > { %p1292_p12 = scmp.ne.s32.totalorder %s1754_s1, %s1291_s28  ;;  %p1298_p5 = scmp.lt.u32.totalorder %s1291_s28, %s1754_s1 }
  0x15   : > { %p1524_p11 = pnand %p1155_p9, %p1495_p1 }
  0x17   : > { %p1293_p13 = pneg %p1524_p11 }
  0x19   : > { %p1294_p0 = pnand %p1293_p13, %p1292_p12 }
  0x1b   : > { %p1295_p3 = pneg %p1294_p0 }
  0x1d   : > { %p1300_p7 = pnand %p1298_p5, %p1295_p3 }
  0x1f   : > { %1303 = shalt.err (!%p1300_p7)
}
  0x20   : > { %s1304_s5 = scalar_lea.vmem %s144_s23, 2048  ;;  %p1312_p1 = scmp.lt.s32.totalorder %s144_s23, %s144_s23 }
  0x21   : > { %p1305_p9 = scmp.ne.s32.totalorder %s144_s23, %s1304_s5  ;;  %p1313_p4 = scmp.lt.s32.totalorder %s1304_s5, %s1304_s5 }
  0x23   : > { %p1307_p10 = pnand %p1305_p9, %p1293_p13  ;;  %p1314_p8 = por %p1313_p4, %p1312_p1 }
  0x25   : > { %p1308_p6 = pneg %p1307_p10 }
  0x27   : > { %p1315_p2 = pnand %p1314_p8, %p1308_p6 }
  0x29   : > { %1318 = shalt.err (!%p1315_p2)
}
  0x2a   : > { %s1438_s6 = smov 64   ;;  %s1439_s7 = smov 4  }
  0x2b   : > { %1158 = dma.hbm_to_vmem [thread:$0]  (!%p1524_p11), %s1754_s1, 2048, %s144_s23, [#allocation6], %s1438_s6, %s1438_s6, %s1439_s7  }
  0x2c   : > { %p40_p1 = scmp.ge.s32.totalorder %s38_s25, 2  ;;  %s47_s16 = sadd.s32 1, %s1423_s11 }
  0x2d   : > { %p54_p2 = scmp.ne.s32.totalorder %s1423_s11, %s1419_s10  ;;  %p55_p4 = scmp.eq.s32.totalorder %s1435_s14, 0 }
  0x2e   : > { %s1781_s25 = smov (%p40_p1, %s38_s25), 0  ;;  %p1767_p8 = scmp.ne.s32.totalorder %s1761_s18, 0 }
  0x2f   : > { %p1551_p6 = por %p55_p4, %p54_p2  ;;  %s42_s24 = ssub.s32 %s1431_s13, %s1781_s25 }
  0x30   : > { %p1557_p10 = por %p1767_p8, %p54_p2  ;;  %p1168_p12 = scmp.lt.s32.totalorder %s1435_s14, 2 }
  0x31   : > { %p45_p11 = scmp.eq.s32.totalorder %s42_s24, 0  ;;  %s157_s23 = sand.u32 1, %s1423_s11  }
  0x32   : > { %s955_s27 = sshll.u32 %s157_s23, 8  ;;  %s1017_s29 = sshll.u32 %s1431_s13, 12 }
  0x33   : > { %s1566_s28 = scalar_select %p45_p11, %s1423_s11, %s47_s16  }
  0x34   : > { %s1572_s4 = scalar_lea.hbm %s1753_s0, %s1017_s29  ;;  %s161_s18 = scalar_lea.vmem [#allocation2], %s955_s27 }
  0x35   : > { %s171_s5 = sshll.u32 %s161_s18, 4  ;;  %p1578_p13 = pnand %p1168_p12, %p1551_p6  ;;  %s1574_s5 = int_to_ptr.vmem [resolvable:$true] %s171_s5 }
  0x36   : > { %s1582_s7 = scalar_lea.sflag [#allocation3], %s157_s23  ;;  %s1319_s8 = scalar_lea.hbm %s1572_s4, 4096 }
  0x37   : > { %p1320_p0 = scmp.ne.s32.totalorder %s1572_s4, %s1319_s8  ;;  %p1321_p3 = pneg %p1578_p13 }
  0x38   : > { %s1324_s22 = scalar_lea.hbm %s1753_s0, 8192  ;;  %p1325_p9 = scmp.lt.u32.totalorder %s1572_s4, %s1753_s0 }
  0x39   : > { %p1322_p5 = pnand %p1321_p3, %p1320_p0  ;;  %p1326_p1 = scmp.lt.u32.totalorder %s1324_s22, %s1319_s8 }
  0x3a   : > { %p1328_p4 = scmp.lt.u32.totalorder %s1319_s8, %s1572_s4 }
  0x3b   : > { %p1323_p7 = pneg %p1322_p5  ;;  %p1327_p2 = por %p1326_p1, %p1325_p9 }
  0x3d   : > { %p1329_p6 = por %p1328_p4, %p1327_p2 }
  0x3f   : > { %p1330_p8 = pnand %p1329_p6, %p1323_p7 }
  0x41   : > { %1333 = shalt.err (!%p1330_p8)
}
  0x42   : > { %s1334_s23 = scalar_lea.vmem %s1574_s5, 4096  ;;  %s1440_s29 = smov [#allocation2]  }
  0x43   : > { %p1335_p12 = scmp.ne.s32.totalorder %s1574_s5, %s1334_s23  ;;  %s1339_s30 = sshll.u32 %s1440_s29, 4  ;;  %s1340_s30 = int_to_ptr.vmem [resolvable:$false] %s1339_s30 }
  0x44   : > { %s1341_s3 = scalar_lea.vmem %s1340_s30, 8192  ;;  %p1342_p5 = scmp.lt.s32.totalorder %s1574_s5, %s1340_s30 }
  0x45   : > { %p1337_p11 = pnand %p1335_p12, %p1321_p3  ;;  %p1343_p9 = scmp.lt.s32.totalorder %s1341_s3, %s1334_s23 }
  0x47   : > { %p1338_p0 = pneg %p1337_p11  ;;  %p1344_p1 = por %p1343_p9, %p1342_p5 }
  0x49   : > { %p1345_p2 = pnand %p1344_p1, %p1338_p0 }
  0x4b   : > { %1348 = shalt.err (!%p1345_p2)
}
  0x4c   : > { %s1441_s18 = smov 128   ;;  %s1442_s8 = smov 8  }
  0x4d   : > { %1162 = dma.hbm_to_vmem [thread:$0]  (!%p1578_p13), %s1572_s4, 4096, %s1574_s5, %s1582_s7, %s1441_s18, %s1441_s18, %s1442_s8  }
  0x4e   : > { %p1770_p3 = scmp.ne.s32.totalorder %s1764_s21, 0 }
  0x4f   : > { %s1613_s15 = sand.u32 (!%p1770_p3), 1, %s1419_s10   ;;  %p1771_p7 = scmp.ne.s32.totalorder (!%p1770_p3), %s1762_s19, 0 }
  0x50   : > { %183 = sbr.rel (%p1770_p3) target bundleno = 412 (0x19c), region = 28  ;;  %s960_s16 = sshll.u32 (!%p1770_p3), %s1613_s15, 8 }
  0x51   : > { %s186_s22 = scalar_lea.sflag (!%p1770_p3), [#allocation3], %s1613_s15  ;;  %s1619_s24 = scalar_lea.vmem (!%p1770_p3), [#allocation2], %s960_s16 }
  0x57   : > { %1402 = dma.done.wait (%p1771_p7), %s186_s22, 4096  }
  0x58   : > { %1404 = vsyncadd (%p1771_p7), %s186_s22, 4294963200  ;;  %p1772_p13 = scmp.ne.s32.totalorder %s1760_s17, 0 }
  0x5a   : > { %1406 = dma.done.wait (%p1772_p13), [#allocation6], 2048  }
  0x5b   : > { %1408 = vsyncadd (%p1772_p13), [#allocation6], 4294965248  ;;  %v1227_v0 = vld [vmem:[#allocation5 + $0x40] sm:$0xff]   ;;  %v1229_v2 = vld [vmem:[#allocation5 + $0x48] sm:$0xff]   ;;  %s1663_s17 = scalar_lea.vmem [#allocation7], %s960_s16  ;;  %s1018_s19 = sshll.u32 %s1427_s12, 12 }
  0x5c   : > { %v1228_v1 = vld [vmem:[#allocation5] sm:$0xff]   ;;  %1019 = vmatprep.subr.bf16.mxu0 %v1227_v0  ;;  %1131 = vmatprep.subr.bf16.mxu1 %v1227_v0  ;;  %v1230_v3 = vld [vmem:[#allocation5 + $0x8] sm:$0xff]   ;;  %v1231_v4 = vld [vmem:[#allocation5 + $0x50] sm:$0xff]   ;;  %s847_s21 = sshll.u32 %s1663_s17, 4  ;;  %s1698_s6 = scalar_lea.hbm %s1755_s2, %s1018_s19  ;;  %s1700_s21 = int_to_ptr.vmem [resolvable:$true] %s847_s21 }
  0x5d   : > { %1020 = vmatpush3.bf16.msra.mxu0 %v1228_v1  ;;  %1139 = vmatpush3.bf16.msra.mxu1 %v1228_v1  ;;  %v1232_v5 = vld [vmem:[#allocation5 + $0x10] sm:$0xff]   ;;  %v1233_v6 = vld [vmem:[#allocation5 + $0x58] sm:$0xff]   ;;  %v1235_v8 = vld [vmem:[#allocation5 + $0x60] sm:$0xff]   ;;  %s833_s12 = scalar_lea.sflag [#allocation4], %s1613_s15  ;;  %s1349_s7 = scalar_lea.vmem %s1700_s21, 4096 }
  0x5e   : > { %1021 = vmatprep.subr.bf16.mxu0 %v1229_v2  ;;  %1132 = vmatprep.subr.bf16.mxu1 %v1229_v2  ;;  %v1234_v7 = vld [vmem:[#allocation5 + $0x18] sm:$0xff]   ;;  %v1236_v9 = vld [vmem:[#allocation5 + $0x20] sm:$0xff]   ;;  %v1237_v10 = vld [vmem:[#allocation5 + $0x68] sm:$0xff]   ;;  %p1350_p4 = scmp.ne.s32.totalorder %s1700_s21, %s1349_s7  ;;  %s1443_s27 = smov [#allocation7]  }
  0x5f   : > { %v1245_v11 = vld [vmem:[%s1619_s24 + $0x4] ss:$8 sps:$4 sm:$0xff]   ;;  %v1239_v14 = vld [vmem:[#allocation5 + $0x70] sm:$0xff]   ;;  %v1241_v16 = vld [vmem:[#allocation5 + $0x78] sm:$0xff]   ;;  %s1353_s23 = sshll.u32 %s1443_s27, 4  ;;  %s1354_s23 = int_to_ptr.vmem [resolvable:$false] %s1353_s23 }
  0x60   : > { %v1248_v12 = vld [vmem:[%s1619_s24 + $0x84] ss:$8 sps:$4 sm:$0xff]   ;;  %639 = vmatprep.mubr.bf16.mxu0 %v1245_v11  ;;  %v1240_v15 = vld [vmem:[#allocation5 + $0x30] sm:$0xff]   ;;  %v1242_v17 = vld [vmem:[#allocation5 + $0x38] sm:$0xff]   ;;  %p1351_p6 = pnand %p1350_p4, %p1557_p10  ;;  %s1355_s29 = scalar_lea.vmem %s1354_s23, 8192 }
  0x61   : > { %1022 = vmatpush3.bf16.msra.mxu0 %v1230_v3  ;;  %1140 = vmatpush3.bf16.msra.mxu1 %v1230_v3  ;;  %v1238_v13 = vld [vmem:[#allocation5 + $0x28] sm:$0xff]   ;;  %v1249_v20 = vld [vmem:[%s1619_s24 + $0x14] ss:$8 sps:$4 sm:$0xff]   ;;  %v1253_v22 = vld [vmem:[%s1619_s24 + $0x10] ss:$8 sps:$4 sm:$0xff]   ;;  %p1356_p12 = scmp.lt.s32.totalorder %s1700_s21, %s1354_s23  ;;  %p1357_p11 = scmp.lt.s32.totalorder %s1355_s29, %s1349_s7 }
  0x62   : > { %1023 = vmatprep.subr.bf16.mxu0 %v1231_v4  ;;  %1133 = vmatprep.subr.bf16.mxu1 %v1231_v4  ;;  %v1243_v18 = vld [vmem:[%s1619_s24] ss:$8 sps:$4 sm:$0xff]   ;;  %v1251_v21 = vld [vmem:[%s1619_s24 + $0x94] ss:$8 sps:$4 sm:$0xff]   ;;  %v1254_v23 = vld [vmem:[%s1619_s24 + $0x90] ss:$8 sps:$4 sm:$0xff]   ;;  %p1352_p8 = pneg %p1351_p6 }
  0x63   : > { %703 = vmatprep.mubr.bf16.mxu1 %v1248_v12  ;;  %v1246_v19 = vld [vmem:[%s1619_s24 + $0x80] ss:$8 sps:$4 sm:$0xff]   ;;  %v1255_v24 = vld [vmem:[%s1619_s24 + $0x24] ss:$8 sps:$4 sm:$0xff]   ;;  %v1261_v28 = vld [vmem:[%s1619_s24 + $0x34] ss:$8 sps:$4 sm:$0xff]   ;;  %p1358_p0 = por %p1357_p11, %p1356_p12 }
  0x64   : > { %v1257_v25 = vld [vmem:[%s1619_s24 + $0xa4] ss:$8 sps:$4 sm:$0xff]   ;;  %v1259_v26 = vld [vmem:[%s1619_s24 + $0x20] ss:$8 sps:$4 sm:$0xff]   ;;  %v1263_v29 = vld [vmem:[%s1619_s24 + $0xb4] ss:$8 sps:$4 sm:$0xff]  }
  0x65   : > { %1024 = vmatpush3.bf16.msra.mxu0 %v1232_v5  ;;  %1141 = vmatpush3.bf16.msra.mxu1 %v1232_v5  ;;  %v1260_v27 = vld [vmem:[%s1619_s24 + $0xa0] ss:$8 sps:$4 sm:$0xff]   ;;  %v1265_v30 = vld [vmem:[%s1619_s24 + $0x30] ss:$8 sps:$4 sm:$0xff]   ;;  %v1267_v32 = vld [vmem:[%s1619_s24 + $0x44] ss:$8 sps:$4 sm:$0xff]   ;;  %p1359_p5 = pnand %p1358_p0, %p1352_p8 }
  0x66   : > { %1025 = vmatprep.subr.bf16.mxu0 %v1233_v6  ;;  %1134 = vmatprep.subr.bf16.mxu1 %v1233_v6  ;;  %v1266_v31 = vld [vmem:[%s1619_s24 + $0xb0] ss:$8 sps:$4 sm:$0xff]   ;;  %v1269_v33 = vld [vmem:[%s1619_s24 + $0xc4] ss:$8 sps:$4 sm:$0xff]   ;;  %v1271_v34 = vld [vmem:[%s1619_s24 + $0x40] ss:$8 sps:$4 sm:$0xff]  }
  0x67   : > { %v1272_v35 = vld [vmem:[%s1619_s24 + $0xc0] ss:$8 sps:$4 sm:$0xff]   ;;  %v1273_v36 = vld [vmem:[%s1619_s24 + $0x54] ss:$8 sps:$4 sm:$0xff]   ;;  %v1277_v38 = vld [vmem:[%s1619_s24 + $0x50] ss:$8 sps:$4 sm:$0xff]  }
  0x68   : > { %v1275_v37 = vld [vmem:[%s1619_s24 + $0xd4] ss:$8 sps:$4 sm:$0xff]   ;;  %v1278_v39 = vld [vmem:[%s1619_s24 + $0xd0] ss:$8 sps:$4 sm:$0xff]   ;;  %v1279_v40 = vld [vmem:[%s1619_s24 + $0x64] ss:$8 sps:$4 sm:$0xff]  }
  0x69   : > { %1026 = vmatpush3.bf16.msra.mxu0 %v1234_v7  ;;  %1142 = vmatpush3.bf16.msra.mxu1 %v1234_v7  ;;  %v1281_v41 = vld [vmem:[%s1619_s24 + $0xe4] ss:$8 sps:$4 sm:$0xff]   ;;  %v1283_v42 = vld [vmem:[%s1619_s24 + $0x60] ss:$8 sps:$4 sm:$0xff]   ;;  %v1285_v44 = vld [vmem:[%s1619_s24 + $0x74] ss:$8 sps:$4 sm:$0xff]  }
  0x6a   : > { %1027 = vmatprep.subr.bf16.mxu0 %v1235_v8  ;;  %1135 = vmatprep.subr.bf16.mxu1 %v1235_v8  ;;  %v1284_v43 = vld [vmem:[%s1619_s24 + $0xe0] ss:$8 sps:$4 sm:$0xff]   ;;  %v1287_v45 = vld [vmem:[%s1619_s24 + $0xf4] ss:$8 sps:$4 sm:$0xff]   ;;  %v1289_v46 = vld [vmem:[%s1619_s24 + $0x70] ss:$8 sps:$4 sm:$0xff]  }
  0x6b   : > { %v1290_v47 = vld [vmem:[%s1619_s24 + $0xf0] ss:$8 sps:$4 sm:$0xff]  }
  0x6d   : > { %1028 = vmatpush3.bf16.msra.mxu0 %v1236_v9  ;;  %1143 = vmatpush3.bf16.msra.mxu1 %v1236_v9 }
  0x6e   : > { %1029 = vmatprep.subr.bf16.mxu0 %v1237_v10  ;;  %1136 = vmatprep.subr.bf16.mxu1 %v1237_v10 }
  0x71   : > { %1030 = vmatpush3.bf16.msra.mxu0 %v1238_v13  ;;  %1144 = vmatpush3.bf16.msra.mxu1 %v1238_v13 }
  0x72   : > { %1031 = vmatprep.subr.bf16.mxu0 %v1239_v14  ;;  %1137 = vmatprep.subr.bf16.mxu1 %v1239_v14 }
  0x75   : > { %1032 = vmatpush3.bf16.msra.mxu0 %v1240_v15  ;;  %1145 = vmatpush3.bf16.msra.mxu1 %v1240_v15 }
  0x76   : > { %1033 = vmatprep.subr.bf16.mxu0 %v1241_v16  ;;  %1138 = vmatprep.subr.bf16.mxu1 %v1241_v16 }
  0x79   : > { %1034 = vmatpush3.bf16.msra.mxu0 %v1242_v17  ;;  %1146 = vmatpush3.bf16.msra.mxu1 %v1242_v17 }
  0x7c   : > { %640 = vmatmul.mubr.bf16.vlgmr.msra.gmra.mrb[0].mxu0 %v1243_v18  ;;  %704 = vmatmul.mubr.bf16.vlgmr.msra.gmra.mrb[0].mxu1 %v1246_v19 }
  0x7d   : > { %647 = vmatprep.mubr.bf16.mxu0 %v1249_v20  ;;  %711 = vmatprep.mubr.bf16.mxu1 %v1251_v21 }
  0x84   : > { %648 = vmatmul.mubr.bf16.gmra.mrb[4].mxu0 %v1253_v22  ;;  %712 = vmatmul.mubr.bf16.gmra.mrb[4].mxu1 %v1254_v23 }
  0x85   : > { %655 = vmatprep.mubr.bf16.mxu0 %v1255_v24  ;;  %719 = vmatprep.mubr.bf16.mxu1 %v1257_v25 }
  0x8c   : > { %656 = vmatmul.mubr.bf16.gmra.mrb[8].mxu0 %v1259_v26  ;;  %720 = vmatmul.mubr.bf16.gmra.mrb[8].mxu1 %v1260_v27 }
  0x8d   : > { %663 = vmatprep.mubr.bf16.mxu0 %v1261_v28  ;;  %727 = vmatprep.mubr.bf16.mxu1 %v1263_v29 }
  0x94   : > { %664 = vmatmul.mubr.bf16.gmra.mrb[12].mxu0 %v1265_v30  ;;  %728 = vmatmul.mubr.bf16.gmra.mrb[12].mxu1 %v1266_v31 }
  0x95   : > { %671 = vmatprep.mubr.bf16.mxu0 %v1267_v32  ;;  %735 = vmatprep.mubr.bf16.mxu1 %v1269_v33 }
  0x9c   : > { %672 = vmatmul.mubr.bf16.gmra.mrb[16].mxu0 %v1271_v34  ;;  %736 = vmatmul.mubr.bf16.gmra.mrb[16].mxu1 %v1272_v35 }
  0x9d   : > { %679 = vmatprep.mubr.bf16.mxu0 %v1273_v36  ;;  %743 = vmatprep.mubr.bf16.mxu1 %v1275_v37 }
  0xa4   : > { %680 = vmatmul.mubr.bf16.gmra.mrb[20].mxu0 %v1277_v38  ;;  %744 = vmatmul.mubr.bf16.gmra.mrb[20].mxu1 %v1278_v39 }
  0xa5   : > { %687 = vmatprep.mubr.bf16.mxu0 %v1279_v40  ;;  %751 = vmatprep.mubr.bf16.mxu1 %v1281_v41 }
  0xac   : > { %688 = vmatmul.mubr.bf16.gmra.mrb[24].mxu0 %v1283_v42  ;;  %752 = vmatmul.mubr.bf16.gmra.mrb[24].mxu1 %v1284_v43 }
  0xad   : > { %695 = vmatprep.mubr.bf16.mxu0 %v1285_v44  ;;  %759 = vmatprep.mubr.bf16.mxu1 %v1287_v45 }
  0xb4   : > { %696 = vmatmul.mubr.bf16.gmra.mrb[28].mxu0 %v1289_v46  ;;  %760 = vmatmul.mubr.bf16.gmra.mrb[28].mxu1 %v1290_v47 }
 0x14f   : > { %v1035_v48 = vpop.f32.mrb[0].mxu0  ;;  %v1083_v49 = vpop.f32.mrb[0].mxu1 }
 0x150   : > { %v1036_v50 = vpop.f32.mrb[1].mxu0  ;;  %v1084_v51 = vpop.f32.mrb[1].mxu1 }
 0x151   : > { %v1037_v52 = vadd.f32 %v1036_v50, %v1035_v48  ;;  %v1085_v53 = vadd.f32 %v1084_v51, %v1083_v49  ;;  %v1038_v54 = vpop.f32.mrb[2].mxu0  ;;  %v1086_v55 = vpop.f32.mrb[2].mxu1 }
 0x152   : > { %v1039_v56 = vpop.f32.mrb[3].mxu0  ;;  %v1087_v57 = vpop.f32.mrb[3].mxu1 }
 0x153   : > { %v1040_v58 = vadd.f32 %v1039_v56, %v1038_v54  ;;  %v1088_v59 = vadd.f32 %v1087_v57, %v1086_v55  ;;  %800 = vst [vmem:[%s1663_s17] sm:$0xff] %v1037_v52  ;;  %816 = vst [vmem:[%s1663_s17 + $0x80] sm:$0xff] %v1085_v53 }
 0x155   : > { %801 = vst [vmem:[%s1663_s17 + $0x8] sm:$0xff] %v1040_v58  ;;  %817 = vst [vmem:[%s1663_s17 + $0x88] sm:$0xff] %v1088_v59 }
 0x157   : > { %v1041_v60 = vpop.f32.mrb[4].mxu0  ;;  %v1089_v61 = vpop.f32.mrb[4].mxu1 }
 0x158   : > { %v1042_v62 = vpop.f32.mrb[5].mxu0  ;;  %v1090_v63 = vpop.f32.mrb[5].mxu1 }
 0x159   : > { %v1043_v0 = vadd.f32 %v1042_v62, %v1041_v60  ;;  %v1091_v1 = vadd.f32 %v1090_v63, %v1089_v61  ;;  %v1044_v2 = vpop.f32.mrb[6].mxu0  ;;  %v1092_v3 = vpop.f32.mrb[6].mxu1 }
 0x15a   : > { %v1045_v4 = vpop.f32.mrb[7].mxu0  ;;  %v1093_v5 = vpop.f32.mrb[7].mxu1 }
 0x15b   : > { %v1046_v6 = vadd.f32 %v1045_v4, %v1044_v2  ;;  %v1094_v7 = vadd.f32 %v1093_v5, %v1092_v3  ;;  %802 = vst [vmem:[%s1663_s17 + $0x10] sm:$0xff] %v1043_v0  ;;  %818 = vst [vmem:[%s1663_s17 + $0x90] sm:$0xff] %v1091_v1 }
 0x15d   : > { %803 = vst [vmem:[%s1663_s17 + $0x18] sm:$0xff] %v1046_v6  ;;  %819 = vst [vmem:[%s1663_s17 + $0x98] sm:$0xff] %v1094_v7 }
 0x15f   : > { %v1047_v8 = vpop.f32.mrb[8].mxu0  ;;  %v1095_v9 = vpop.f32.mrb[8].mxu1 }
 0x160   : > { %v1048_v10 = vpop.f32.mrb[9].mxu0  ;;  %v1096_v11 = vpop.f32.mrb[9].mxu1 }
 0x161   : > { %v1049_v12 = vadd.f32 %v1048_v10, %v1047_v8  ;;  %v1097_v13 = vadd.f32 %v1096_v11, %v1095_v9  ;;  %v1050_v14 = vpop.f32.mrb[10].mxu0  ;;  %v1098_v15 = vpop.f32.mrb[10].mxu1 }
 0x162   : > { %v1051_v16 = vpop.f32.mrb[11].mxu0  ;;  %v1099_v17 = vpop.f32.mrb[11].mxu1 }
 0x163   : > { %v1052_v18 = vadd.f32 %v1051_v16, %v1050_v14  ;;  %v1100_v19 = vadd.f32 %v1099_v17, %v1098_v15  ;;  %804 = vst [vmem:[%s1663_s17 + $0x20] sm:$0xff] %v1049_v12  ;;  %820 = vst [vmem:[%s1663_s17 + $0xa0] sm:$0xff] %v1097_v13 }
 0x165   : > { %805 = vst [vmem:[%s1663_s17 + $0x28] sm:$0xff] %v1052_v18  ;;  %821 = vst [vmem:[%s1663_s17 + $0xa8] sm:$0xff] %v1100_v19 }
 0x167   : > { %v1053_v20 = vpop.f32.mrb[12].mxu0  ;;  %v1101_v21 = vpop.f32.mrb[12].mxu1 }
 0x168   : > { %v1054_v22 = vpop.f32.mrb[13].mxu0  ;;  %v1102_v23 = vpop.f32.mrb[13].mxu1 }
 0x169   : > { %v1055_v24 = vadd.f32 %v1054_v22, %v1053_v20  ;;  %v1103_v25 = vadd.f32 %v1102_v23, %v1101_v21  ;;  %v1056_v26 = vpop.f32.mrb[14].mxu0  ;;  %v1104_v27 = vpop.f32.mrb[14].mxu1 }
 0x16a   : > { %v1057_v28 = vpop.f32.mrb[15].mxu0  ;;  %v1105_v29 = vpop.f32.mrb[15].mxu1 }
 0x16b   : > { %v1058_v30 = vadd.f32 %v1057_v28, %v1056_v26  ;;  %v1106_v31 = vadd.f32 %v1105_v29, %v1104_v27  ;;  %806 = vst [vmem:[%s1663_s17 + $0x30] sm:$0xff] %v1055_v24  ;;  %822 = vst [vmem:[%s1663_s17 + $0xb0] sm:$0xff] %v1103_v25 }
 0x16d   : > { %807 = vst [vmem:[%s1663_s17 + $0x38] sm:$0xff] %v1058_v30  ;;  %823 = vst [vmem:[%s1663_s17 + $0xb8] sm:$0xff] %v1106_v31 }
 0x16f   : > { %v1059_v32 = vpop.f32.mrb[16].mxu0  ;;  %v1107_v33 = vpop.f32.mrb[16].mxu1 }
 0x170   : > { %v1060_v34 = vpop.f32.mrb[17].mxu0  ;;  %v1108_v35 = vpop.f32.mrb[17].mxu1 }
 0x171   : > { %v1061_v36 = vadd.f32 %v1060_v34, %v1059_v32  ;;  %v1109_v37 = vadd.f32 %v1108_v35, %v1107_v33  ;;  %v1062_v38 = vpop.f32.mrb[18].mxu0  ;;  %v1110_v39 = vpop.f32.mrb[18].mxu1 }
 0x172   : > { %v1063_v40 = vpop.f32.mrb[19].mxu0  ;;  %v1111_v41 = vpop.f32.mrb[19].mxu1 }
 0x173   : > { %v1064_v42 = vadd.f32 %v1063_v40, %v1062_v38  ;;  %v1112_v43 = vadd.f32 %v1111_v41, %v1110_v39  ;;  %808 = vst [vmem:[%s1663_s17 + $0x40] sm:$0xff] %v1061_v36  ;;  %824 = vst [vmem:[%s1663_s17 + $0xc0] sm:$0xff] %v1109_v37 }
 0x175   : > { %809 = vst [vmem:[%s1663_s17 + $0x48] sm:$0xff] %v1064_v42  ;;  %825 = vst [vmem:[%s1663_s17 + $0xc8] sm:$0xff] %v1112_v43 }
 0x177   : > { %v1065_v44 = vpop.f32.mrb[20].mxu0  ;;  %v1113_v45 = vpop.f32.mrb[20].mxu1 }
 0x178   : > { %v1066_v46 = vpop.f32.mrb[21].mxu0  ;;  %v1114_v47 = vpop.f32.mrb[21].mxu1 }
 0x179   : > { %v1067_v48 = vadd.f32 %v1066_v46, %v1065_v44  ;;  %v1115_v49 = vadd.f32 %v1114_v47, %v1113_v45  ;;  %v1068_v50 = vpop.f32.mrb[22].mxu0  ;;  %v1116_v51 = vpop.f32.mrb[22].mxu1 }
 0x17a   : > { %v1069_v52 = vpop.f32.mrb[23].mxu0  ;;  %v1117_v53 = vpop.f32.mrb[23].mxu1 }
 0x17b   : > { %v1070_v54 = vadd.f32 %v1069_v52, %v1068_v50  ;;  %v1118_v55 = vadd.f32 %v1117_v53, %v1116_v51  ;;  %810 = vst [vmem:[%s1663_s17 + $0x50] sm:$0xff] %v1067_v48  ;;  %826 = vst [vmem:[%s1663_s17 + $0xd0] sm:$0xff] %v1115_v49 }
 0x17d   : > { %811 = vst [vmem:[%s1663_s17 + $0x58] sm:$0xff] %v1070_v54  ;;  %827 = vst [vmem:[%s1663_s17 + $0xd8] sm:$0xff] %v1118_v55 }
 0x17f   : > { %v1071_v56 = vpop.f32.mrb[24].mxu0  ;;  %v1119_v57 = vpop.f32.mrb[24].mxu1 }
 0x180   : > { %v1072_v58 = vpop.f32.mrb[25].mxu0  ;;  %v1120_v59 = vpop.f32.mrb[25].mxu1 }
 0x181   : > { %v1073_v60 = vadd.f32 %v1072_v58, %v1071_v56  ;;  %v1121_v61 = vadd.f32 %v1120_v59, %v1119_v57  ;;  %v1074_v62 = vpop.f32.mrb[26].mxu0  ;;  %v1122_v63 = vpop.f32.mrb[26].mxu1 }
 0x182   : > { %v1075_v0 = vpop.f32.mrb[27].mxu0  ;;  %v1123_v1 = vpop.f32.mrb[27].mxu1 }
 0x183   : > { %v1076_v2 = vadd.f32 %v1075_v0, %v1074_v62  ;;  %v1124_v3 = vadd.f32 %v1123_v1, %v1122_v63  ;;  %812 = vst [vmem:[%s1663_s17 + $0x60] sm:$0xff] %v1073_v60  ;;  %828 = vst [vmem:[%s1663_s17 + $0xe0] sm:$0xff] %v1121_v61 }
 0x185   : > { %813 = vst [vmem:[%s1663_s17 + $0x68] sm:$0xff] %v1076_v2  ;;  %829 = vst [vmem:[%s1663_s17 + $0xe8] sm:$0xff] %v1124_v3 }
 0x187   : > { %v1077_v4 = vpop.f32.mrb[28].mxu0  ;;  %v1125_v5 = vpop.f32.mrb[28].mxu1 }
 0x188   : > { %v1078_v6 = vpop.f32.mrb[29].mxu0  ;;  %v1126_v7 = vpop.f32.mrb[29].mxu1 }
 0x189   : > { %v1079_v8 = vadd.f32 %v1078_v6, %v1077_v4  ;;  %v1127_v9 = vadd.f32 %v1126_v7, %v1125_v5  ;;  %v1080_v10 = vpop.f32.mrb[30].mxu0  ;;  %v1128_v11 = vpop.f32.mrb[30].mxu1 }
 0x18a   : > { %v1081_v12 = vpop.f32.mrb[31].mxu0  ;;  %v1129_v13 = vpop.f32.mrb[31].mxu1 }
 0x18b   : > { %v1082_v14 = vadd.f32 %v1081_v12, %v1080_v10  ;;  %v1130_v15 = vadd.f32 %v1129_v13, %v1128_v11  ;;  %814 = vst [vmem:[%s1663_s17 + $0x70] sm:$0xff] %v1079_v8  ;;  %830 = vst [vmem:[%s1663_s17 + $0xf0] sm:$0xff] %v1127_v9 }
 0x18d   : > { %815 = vst [vmem:[%s1663_s17 + $0x78] sm:$0xff] %v1082_v14  ;;  %831 = vst [vmem:[%s1663_s17 + $0xf8] sm:$0xff] %v1130_v15 }
 0x18e   : > { %1362 = shalt.err (!%p1359_p5)
}
 0x18f   : > { %s1363_s30 = scalar_lea.hbm %s1698_s6, 4096  ;;  %s1367_s8 = scalar_lea.hbm %s1755_s2, 8192 }
 0x190   : > { %p1364_p9 = scmp.ne.s32.totalorder %s1698_s6, %s1363_s30  ;;  %p1368_p3 = scmp.lt.u32.totalorder %s1698_s6, %s1755_s2 }
 0x191   : > { %p1369_p7 = scmp.lt.u32.totalorder %s1367_s8, %s1363_s30  ;;  %p1371_p4 = scmp.lt.u32.totalorder %s1363_s30, %s1698_s6 }
 0x192   : > { %p1365_p1 = pnand %p1364_p9, %p1557_p10 }
 0x193   : > { %p1370_p13 = por %p1369_p7, %p1368_p3 }
 0x194   : > { %p1366_p2 = pneg %p1365_p1 }
 0x195   : > { %p1372_p6 = por %p1371_p4, %p1370_p13 }
 0x197   : > { %p1373_p8 = pnand %p1372_p6, %p1366_p2 }
 0x199   : > { %1376 = shalt.err (!%p1373_p8)
}
 0x19a   : > { %s1444_s24 = smov 128   ;;  %s1445_s17 = smov 8  }
 0x19b   : > { %1153 = dma.vmem_to_hbm [thread:$0]  (%p1557_p10), %s1700_s21, 4096, %s1698_s6, %s833_s12, %s1444_s24, %s1444_s24, %s1445_s17  }
 0x19c PF: > { %s862_s19 = sand.u32 1, %s1415_s9   ;;  %p1773_p12 = scmp.ne.s32.totalorder %s1763_s20, 0 }
 0x19d   : > { %p1774_p11 = scmp.ge.s32.totalorder %s1435_s14, 2  ;;  %s863_s4 = scalar_lea.sflag [#allocation4], %s862_s19 }
 0x19f   : > { %p1164_p0 = pnand %p1774_p11, %p1773_p12 }
 0x1a1   : > { %1410 = dma.done.wait (!%p1164_p0), %s863_s4, 4096  }
 0x1a2   : > { %1412 = vsyncadd (!%p1164_p0), %s863_s4, 4294963200  ;;  %s19_s14 = sadd.s32 1, %s1435_s14   ;;  %s1775_s9 = smov %s1419_s10 }
 0x1a3   : > { %p16_p5 = scmp.ge.s32.totalorder %s19_s14, 4   ;;  %s1776_s10 = smov %s1423_s11 }
 0x1a4   : > { %s1777_s11 = smov %s1566_s28  ;;  %s1778_s12 = smov %s1431_s13 }
 0x1a5   : > { %s1779_s13 = smov %s1781_s25  ;;  %18 = sbr.rel (!%p16_p5) target bundleno = 7 (0x7), region = 82 }
 0x1ac   :  { %868 = vsyncpa [#allocation3], 1 }
 0x1ad   :  { %870 = vsyncpa [#allocation3 + $0x1], 1 }
 0x1ae   :  { %871 = vsyncpa [#allocation6], 1 }
 0x1af   :  { %872 = vsyncpa [#allocation4], 1 }
 0x1b0   :  { %874 = vsyncpa [#allocation4 + $0x1], 1 }

</bundles_post_ra>
